<compile_context>
chip_gen: v7x
topology: tpu7x:2x2x1
jax: 0.10.0
libtpu: 0.0.40
codegen_flags: <defaults>
</compile_context>

<pallas_src>
import math

import jax
import jax.numpy as jnp
from jax.experimental import pallas as pl
from jax.experimental.pallas import tpu as pltpu


def _round_up(x, m):
    return ((x + m - 1) // m) * m


def _make_kernel(use_acc_scratch):
    def kernel(x_ref, w_ref, b_ref, t_ref, bs_ref, o_ref, *scratch):
        # For f32 outputs the output block index is k-invariant, so the block
        # stays resident in VMEM across the K sweep and we accumulate into it
        # directly (no scratch).  For narrower output dtypes keep an f32
        # scratch accumulator and cast in the epilogue.
        acc_ref = scratch[0] if use_acc_scratch else o_ref
        k = pl.program_id(2)
        nk = pl.num_programs(2)

        @pl.when(k == 0)
        def _():
            # Initialize with bias + LoRA term (scale pre-folded into bs_ref),
            # so the last-k epilogue is just a cast (or nothing for f32 out).
            acc_ref[...] = b_ref[...] + jnp.dot(
                t_ref[...], bs_ref[...], preferred_element_type=jnp.float32)

        # Base path: accumulate x @ W^T in f32 on the MXU.
        acc_ref[...] += jnp.dot(x_ref[...], w_ref[...],
                                preferred_element_type=jnp.float32)

        if use_acc_scratch:
            @pl.when(k == nk - 1)
            def _():
                o_ref[...] = acc_ref[...].astype(o_ref.dtype)

    return kernel


def prepare_lora_linear(weight, bias, lora_A, lora_B, *, alpha=1,
                        tn_max=512, tk_max=1024, mxu_dtype=jnp.bfloat16):
    """One-time (cacheable) parameter preprocessing, out of the forward hot path.

    weight: (out, in), bias: (out,), lora_A: (rank, in), lora_B: (out, rank)
    — PyTorch conventions.
    """
    out_features, in_features = weight.shape
    rank = lora_A.shape[0]
    scale = alpha / rank

    # Tile sizes: multiples of (8, 128) (or the full, already-legal extent for
    # tiny problems).  512/1024 defaults put arithmetic intensity at/above the
    # HBM ridge on v5e/v7x while keeping the working set ~8 MiB.
    tn = min(tn_max, _round_up(out_features, 128))
    tk = min(tk_max, _round_up(in_features, 128))
    Np = _round_up(out_features, tn)          # lane-dense output (>= 128)
    Kp = _round_up(in_features, tk)

    # Pre-transpose once, zero-pad to tile multiples, cast MXU operands bf16.
    wT_p = jnp.pad(weight.T,
                   ((0, Kp - in_features), (0, Np - out_features))
                   ).astype(mxu_dtype)
    # Fold scale into B^T so the kernel epilogue has no extra VPU pass.
    bsT_p = jnp.pad(lora_B.T * scale,
                    ((0, 0), (0, Np - out_features))).astype(mxu_dtype)
    bias_p = jnp.pad(bias, (0, Np - out_features)
                     ).reshape(1, Np).astype(jnp.float32)
    aT = lora_A.T.astype(jnp.float32)          # (in, rank), for the hoisted matmul

    return dict(wT_p=wT_p, bsT_p=bsT_p, bias_p=bias_p, aT=aT,
                in_features=in_features, out_features=out_features, rank=rank,
                tn=tn, tk=tk, Np=Np, Kp=Kp, mxu_dtype=mxu_dtype)


def lora_linear_apply(params, x, *, tm_max=512):
    """Hot path: x (..., in_features) -> (..., out_features)."""
    in_features = params["in_features"]
    out_features = params["out_features"]
    rank = params["rank"]
    tn, tk, Np, Kp = params["tn"], params["tk"], params["Np"], params["Kp"]
    mxu_dtype = params["mxu_dtype"]

    lead = x.shape[:-1]
    xm = x.reshape(-1, in_features)
    M = xm.shape[0]

    # bf16 packs two rows per sublane -> round the M tile/padding to 16, not 8.
    tm = min(tm_max, _round_up(M, 16))
    Mp = _round_up(M, tm)

    # LoRA intermediate hoisted out of the kernel: rank << 128, so an in-kernel
    # (tm, tk)@(tk, rank) dot wastes MXU columns and forces extra DMAs.  It is
    # a tiny matmul, so compute it once here in f32 and stream it in.
    t = jnp.dot(xm, params["aT"], preferred_element_type=jnp.float32)
    t_p = jnp.pad(t, ((0, Mp - M), (0, 0))).astype(mxu_dtype)        # (Mp, rank)

    xm_p = jnp.pad(xm, ((0, Mp - M), (0, Kp - in_features))).astype(mxu_dtype)

    grid = (Mp // tm, Np // tn, Kp // tk)
    ni, nj, _nk = grid

    out_dtype = x.dtype
    use_acc_scratch = out_dtype != jnp.float32
    scratch_shapes = ([pltpu.VMEM((tm, tn), jnp.float32)]
                      if use_acc_scratch else [])

    itemsize = jnp.dtype(mxu_dtype).itemsize
    out_itemsize = jnp.dtype(out_dtype).itemsize
    flops = 2 * Mp * Kp * Np + 2 * Mp * rank * Np
    # Count cross-tile re-reads: x is streamed nj times, W^T ni times.
    bytes_accessed = (itemsize * (Mp * Kp * nj + Kp * Np * ni
                                  + Mp * rank * nj + rank * Np * ni)
                      + 4 * Np * ni + out_itemsize * Mp * Np)

    out = pl.pallas_call(
        _make_kernel(use_acc_scratch),
        out_shape=jax.ShapeDtypeStruct((Mp, Np), out_dtype),
        grid_spec=pltpu.PrefetchScalarGridSpec(
            num_scalar_prefetch=0,
            grid=grid,
            in_specs=[
                pl.BlockSpec((tm, tk), lambda i, j, k: (i, k)),      # x
                pl.BlockSpec((tk, tn), lambda i, j, k: (k, j)),      # W^T
                pl.BlockSpec((1, tn), lambda i, j, k: (0, j)),       # bias
                pl.BlockSpec((tm, rank), lambda i, j, k: (i, 0)),    # t = x @ A^T
                pl.BlockSpec((rank, tn), lambda i, j, k: (0, j)),    # scale * B^T
            ],
            out_specs=pl.BlockSpec((tm, tn), lambda i, j, k: (i, j)),
            scratch_shapes=scratch_shapes),
        compiler_params=pltpu.CompilerParams(
            # With x@A^T hoisted there is no cross-tile state on N anymore:
            # both M and N shard across cores (helps v7x's 2 TCs); K reduces.
            dimension_semantics=("parallel", "parallel", "arbitrary"),
            # Explicit scoped-VMEM budget: comfortably above the ~8 MiB
            # working set, safe on v7x's 64 MiB physical VMEM.
            vmem_limit_bytes=48 * 1024 * 1024),
        cost_estimate=pl.CostEstimate(
            flops=flops, transcendentals=0, bytes_accessed=bytes_accessed),
    )(xm_p, params["wT_p"], params["bias_p"], t_p, params["bsT_p"])

    return out[:M, :out_features].reshape(*lead, out_features)


def lora_linear(x, weight, bias, lora_A, lora_B, *, alpha=1,
                tm_max=512, tn_max=512, tk_max=1024, mxu_dtype=jnp.bfloat16):
    """Convenience wrapper: prepare (uncached) + apply."""
    params = prepare_lora_linear(weight, bias, lora_A, lora_B, alpha=alpha,
                                 tn_max=tn_max, tk_max=tk_max,
                                 mxu_dtype=mxu_dtype)
    return lora_linear_apply(params, x, tm_max=tm_max)


if __name__ == "__main__":
    # Shapes implied by the module: Linear(in_features=32, out_features=32),
    # rank=4, alpha=1, activation x of shape (batch=2, seq=8, 32).
    in_features, out_features, rank, alpha = 32, 32, 4, 1
    batch, seq = 2, 8

    key = jax.random.PRNGKey(0)
    kx, kw, kb, ka, kbb = jax.random.split(key, 5)

    x = jax.random.normal(kx, (batch, seq, in_features), dtype=jnp.float32)

    # Deterministic synthetic parameters matching the module's shapes.
    bound_w = 1.0 / math.sqrt(in_features)
    weight = jax.random.uniform(kw, (out_features, in_features),
                                minval=-bound_w, maxval=bound_w,
                                dtype=jnp.float32)
    bias = jax.random.uniform(kb, (out_features,),
                              minval=-bound_w, maxval=bound_w,
                              dtype=jnp.float32)
    # lora_A ~ kaiming_uniform(a=sqrt(5)); lora_B is zeros in the module but we
    # use small random values so the LoRA matmul path is actually exercised.
    bound_a = math.sqrt(6.0 / (1 + 5)) / math.sqrt(in_features)
    lora_A = jax.random.uniform(ka, (rank, in_features),
                                minval=-bound_a, maxval=bound_a,
                                dtype=jnp.float32)
    lora_B = 0.01 * jax.random.normal(kbb, (out_features, rank),
                                      dtype=jnp.float32)

    # Prepare once (cacheable), apply in the hot path.
    params = prepare_lora_linear(weight, bias, lora_A, lora_B, alpha=alpha)
    y = lora_linear_apply(params, x)
    y = jax.block_until_ready(y)

    # Reference (plain f32 JAX) check of the exact PyTorch semantics.
    # The kernel feeds the MXU in bf16 (f32 accumulation), so tolerance is
    # loosened to bf16-level relative error.
    scale = alpha / rank
    y_ref = x @ weight.T + bias + (x @ lora_A.T @ lora_B.T) * scale
    assert y.shape == (batch, seq, out_features)
    assert jnp.allclose(y, y_ref, atol=5e-2, rtol=5e-2), (
        float(jnp.max(jnp.abs(y - y_ref))))

    print("KERNEL_OK")
</pallas_src>

<mosaic_0001>
module attributes {stable_mosaic.version = 11 : i64} {
  func.func @kernel(%arg0: i32, %arg1: i32, %arg2: i32, %arg3: memref<16x128xbf16, #tpu.memory_space<vmem>>, %arg4: memref<128x128xbf16, #tpu.memory_space<vmem>>, %arg5: memref<1x128xf32, #tpu.memory_space<vmem>>, %arg6: memref<16x4xbf16, #tpu.memory_space<vmem>>, %arg7: memref<4x128xbf16, #tpu.memory_space<vmem>>, %arg8: memref<16x128xf32, #tpu.memory_space<vmem>>) attributes {dimension_semantics = [#tpu.dimension_semantics<parallel>, #tpu.dimension_semantics<parallel>, #tpu.dimension_semantics<arbitrary>], iteration_bounds = array<i64: 1, 1, 1>, scalar_prefetch = 0 : i64, scratch_operands = 0 : i64, tpu.core_type = #tpu.core_type<tc>, window_params = [{transform_indices = @transform_0, window_bounds = array<i64: 16, 128>}, {transform_indices = @transform_1, window_bounds = array<i64: 128, 128>}, {transform_indices = @transform_2, window_bounds = array<i64: 1, 128>}, {transform_indices = @transform_3, window_bounds = array<i64: 16, 4>}, {transform_indices = @transform_4, window_bounds = array<i64: 4, 128>}, {transform_indices = @transform_5, window_bounds = array<i64: 16, 128>}]} {
    %c0_i32 = arith.constant 0 : i32
    %0 = arith.cmpi eq, %arg2, %c0_i32 : i32
    %1 = arith.extui %0 : i1 to i32
    %c0_i32_0 = arith.constant 0 : i32
    %2 = arith.cmpi ne, %1, %c0_i32_0 : i32
    scf.if %2 {
      %c0_8 = arith.constant 0 : index
      %c0_9 = arith.constant 0 : index
      %9 = vector.load %arg5[%c0_8, %c0_9] : memref<1x128xf32, #tpu.memory_space<vmem>>, vector<1x128xf32>
      %c0_10 = arith.constant 0 : index
      %c0_11 = arith.constant 0 : index
      %10 = vector.load %arg6[%c0_10, %c0_11] : memref<16x4xbf16, #tpu.memory_space<vmem>>, vector<16x4xbf16>
      %c0_12 = arith.constant 0 : index
      %c0_13 = arith.constant 0 : index
      %11 = vector.load %arg7[%c0_12, %c0_13] : memref<4x128xbf16, #tpu.memory_space<vmem>>, vector<4x128xbf16>
      %cst_14 = arith.constant dense<0.000000e+00> : vector<16x128xf32>
      %12 = tpu.matmul %10, %11, %cst_14 {dimension_numbers = #tpu.dot_dimension_numbers<[1], [0], [0], [1], [0, 0, 1, 1], [], []>} : vector<16x4xbf16>, vector<4x128xbf16>, vector<16x128xf32> -> vector<16x128xf32>
      %13 = vector.broadcast %9 : vector<1x128xf32> to vector<16x128xf32>
      %14 = arith.addf %13, %12 : vector<16x128xf32>
      %c0_15 = arith.constant 0 : index
      %c0_16 = arith.constant 0 : index
      %15 = vector.load %arg8[%c0_15, %c0_16] : memref<16x128xf32, #tpu.memory_space<vmem>>, vector<16x128xf32>
      tpu.vector_store %arg8[%c0_15, %c0_16], %14 {strides = array<i32>} : memref<16x128xf32, #tpu.memory_space<vmem>>, vector<16x128xf32>,
    } else {
    }
    %c0 = arith.constant 0 : index
    %c0_1 = arith.constant 0 : index
    %3 = vector.load %arg8[%c0, %c0_1] : memref<16x128xf32, #tpu.memory_space<vmem>>, vector<16x128xf32>
    %c0_2 = arith.constant 0 : index
    %c0_3 = arith.constant 0 : index
    %4 = vector.load %arg3[%c0_2, %c0_3] : memref<16x128xbf16, #tpu.memory_space<vmem>>, vector<16x128xbf16>
    %c0_4 = arith.constant 0 : index
    %c0_5 = arith.constant 0 : index
    %5 = vector.load %arg4[%c0_4, %c0_5] : memref<128x128xbf16, #tpu.memory_space<vmem>>, vector<128x128xbf16>
    %cst = arith.constant dense<0.000000e+00> : vector<16x128xf32>
    %6 = tpu.matmul %4, %5, %cst {dimension_numbers = #tpu.dot_dimension_numbers<[1], [0], [0], [1], [0, 0, 1, 1], [], []>} : vector<16x128xbf16>, vector<128x128xbf16>, vector<16x128xf32> -> vector<16x128xf32>
    %7 = arith.addf %3, %6 : vector<16x128xf32>
    %c0_6 = arith.constant 0 : index
    %c0_7 = arith.constant 0 : index
    %8 = vector.load %arg8[%c0_6, %c0_7] : memref<16x128xf32, #tpu.memory_space<vmem>>, vector<16x128xf32>
    tpu.vector_store %arg8[%c0_6, %c0_7], %7 {strides = array<i32>} : memref<16x128xf32, #tpu.memory_space<vmem>>, vector<16x128xf32>,
    return
  }
  func.func @transform_0(%arg0: i32, %arg1: i32, %arg2: i32) -> (i32, i32) {
    %c0_i32 = arith.constant 0 : i32
    return %arg0, %arg2 : i32, i32
  }
  func.func @transform_1(%arg0: i32, %arg1: i32, %arg2: i32) -> (i32, i32) {
    %c0_i32 = arith.constant 0 : i32
    return %arg2, %arg1 : i32, i32
  }
  func.func @transform_2(%arg0: i32, %arg1: i32, %arg2: i32) -> (i32, i32) {
    %c0_i32 = arith.constant 0 : i32
    %c0_i32_0 = arith.constant 0 : i32
    return %c0_i32, %arg1 : i32, i32
  }
  func.func @transform_3(%arg0: i32, %arg1: i32, %arg2: i32) -> (i32, i32) {
    %c0_i32 = arith.constant 0 : i32
    %c0_i32_0 = arith.constant 0 : i32
    return %arg0, %c0_i32 : i32, i32
  }
  func.func @transform_4(%arg0: i32, %arg1: i32, %arg2: i32) -> (i32, i32) {
    %c0_i32 = arith.constant 0 : i32
    %c0_i32_0 = arith.constant 0 : i32
    return %c0_i32, %arg1 : i32, i32
  }
  func.func @transform_5(%arg0: i32, %arg1: i32, %arg2: i32) -> (i32, i32) {
    %c0_i32 = arith.constant 0 : i32
    return %arg0, %arg1 : i32, i32
  }
}

</mosaic_0001>

<bundles_post_ra>
// kernel: tpu_custom_call.1
= control target key start
LH: loop header
LB: loop body
LE: loop exit
PB: predicated region body
PF: predicated region fallthrough
CT: control target
= control target key end

     0   :  { %10 = vsyncpa [#allocation3], 0  ;;  %s441_s0 = inlined_call_operand.vmem [shape: bf16[16,128], index: 0, kind: input, shape index: {}]   ;;  %s442_s1 = inlined_call_operand.hbm [shape: bf16[128,128], index: 1, kind: input, shape index: {}]   ;;  %s443_s2 = inlined_call_operand.vmem [shape: f32[1,128], index: 2, kind: input, shape index: {}]   ;;  %s444_s3 = inlined_call_operand.vmem [shape: bf16[16,4], index: 3, kind: input, shape index: {}]   ;;  %s445_s4 = inlined_call_operand.vmem [shape: bf16[4,128], index: 4, kind: input, shape index: {}]   ;;  %s446_s5 = inlined_call_operand.hbm [shape: f32[16,128], index: 5, kind: output, shape index: {}]  }
   0x1   :  { %11 = vsyncpa [#allocation4], 0  ;;  %s367_s18 = smov [#allocation2]   ;;  %s319_s22 = scalar_lea.hbm %s442_s1, 1024 }
   0x2   :  { %s19_s19 = sshll.u32 %s367_s18, 4  ;;  %p320_p0 = scmp.ne.s32.totalorder %s442_s1, %s319_s22  ;;  %s20_s19 = int_to_ptr.vmem [resolvable:$true] %s19_s19 }
   0x3   :  { %p323_p1 = scmp.lt.u32.totalorder %s319_s22, %s442_s1 }
   0x5   :  { %p325_p2 = pnand %p323_p1, %p320_p0 }
   0x7   :  { %328 = shalt.err (!%p325_p2)
}
   0x8   :  { %s329_s27 = scalar_lea.vmem %s20_s19, 1024  ;;  %p334_p4 = scmp.lt.s32.totalorder %s20_s19, %s20_s19 }
   0x9   :  { %p330_p3 = scmp.ne.s32.totalorder %s20_s19, %s329_s27  ;;  %p335_p5 = scmp.lt.s32.totalorder %s329_s27, %s329_s27 }
   0xb   :  { %p336_p6 = por %p335_p5, %p334_p4 }
   0xd   :  { %p337_p7 = pnand %p336_p6, %p330_p3 }
   0xf   :  { %340 = shalt.err (!%p337_p7)
}
  0x10   :  { %s368_s28 = smov 64   ;;  %s369_s29 = smov 4  }
  0x11   :  { %25 = dma.hbm_to_vmem [thread:$0]  %s442_s1, 1024, %s20_s19, [#allocation3], %s368_s28, %s368_s28, %s369_s29  }
  0x12   :  { %363 = dma.done.wait [#allocation3], 1024  }
  0x13   :  { %364 = vsyncadd [#allocation3], 4294966272  ;;  %v370_v0 = vmov 0.0   ;;  %vm371_vm0 = vmmov 0   ;;  %v309_v1 = vld [vmem:[#allocation2] sm:$0xff]   ;;  %v310_v2 = vld [vmem:[#allocation2 + $0x8] sm:$0xff]  }
  0x14   :  { %273 = vmatprep.subr.bf16.mxu0 %v370_v0  ;;  %267 = vmatprep.subr.bf16.mxu1 %v370_v0  ;;  %vm53_vm1 = vcmask 1041408   ;;  %v43_v3 = vld [vmem:[%s445_s4] sm:$0x3]  ;;  %v311_v4 = vld [vmem:[#allocation2 + $0x10] sm:$0xff]   ;;  %vm49_vm2 = vcmask 31744   ;;  %v312_v7 = vld [vmem:[#allocation2 + $0x18] sm:$0xff]  }
  0x15   :  { %269 = vmatprep.mubr.msk.bf16.mxu1 %vm371_vm0, %v370_v0  ;;  %289 = vmatprep.mubr.msk.bf16.mxu0 %vm371_vm0, %v370_v0  ;;  %v55_v5 = vsel %vm53_vm1, %v43_v3, 0  ;;  %v314_v6 = vld [vmem:[%s444_s3] sm:$0xff]   ;;  %v315_v9 = vld [vmem:[#allocation2 + $0x28] sm:$0xff]   ;;  %v316_v10 = vld [vmem:[#allocation2 + $0x30] sm:$0xff]   ;;  %s372_s12 = smov [#allocation5]  }
  0x16   :  { %274 = vmatpush3.bf16.msra.mxu0 %v309_v1  ;;  %268 = vmatpush3.bf16.msra.mxu1 %v55_v5  ;;  %v313_v8 = vld [vmem:[#allocation2 + $0x20] sm:$0xff]   ;;  %v317_v11 = vld [vmem:[#allocation2 + $0x38] sm:$0xff]   ;;  %s232_s13 = sshll.u32 %s372_s12, 4  ;;  %s233_s13 = int_to_ptr.vmem [resolvable:$true] %s232_s13 }
  0x17   :  { %275 = vmatprep.subr.bf16.mxu0 %v370_v0  ;;  %v318_v12 = vld [vmem:[%s441_s0] sm:$0xff]   ;;  %s341_s0 = scalar_lea.vmem %s233_s13, 256  ;;  %p346_p9 = scmp.lt.s32.totalorder %s233_s13, %s233_s13 }
  0x18   :  { %v246_v17 = vld [vmem:[%s443_s2] ss:$0 sm:$0xff]  ;;  %p342_p8 = scmp.ne.s32.totalorder %s233_s13, %s341_s0  ;;  %p347_p10 = scmp.lt.s32.totalorder %s341_s0, %s341_s0 }
  0x19   :  { %270 = vmatmul.mubr.msk.bf16.vlgmr.msra.gmra.mrb[0].mxu1 %vm49_vm2, %v314_v6 }
  0x1a   :  { %276 = vmatpush3.bf16.msra.mxu0 %v310_v2  ;;  %p348_p11 = por %p347_p10, %p346_p9 }
  0x1b   :  { %277 = vmatprep.subr.bf16.mxu0 %v370_v0 }
  0x1c   :  { %p349_p12 = pnand %p348_p11, %p342_p8 }
  0x1e   :  { %278 = vmatpush3.bf16.msra.mxu0 %v311_v4 }
  0x1f   :  { %279 = vmatprep.subr.bf16.mxu0 %v370_v0 }
  0x22   :  { %280 = vmatpush3.bf16.msra.mxu0 %v312_v7 }
  0x23   :  { %281 = vmatprep.subr.bf16.mxu0 %v370_v0 }
  0x26   :  { %282 = vmatpush3.bf16.msra.mxu0 %v313_v8 }
  0x27   :  { %283 = vmatprep.subr.bf16.mxu0 %v370_v0 }
  0x2a   :  { %284 = vmatpush3.bf16.msra.mxu0 %v315_v9 }
  0x2b   :  { %285 = vmatprep.subr.bf16.mxu0 %v370_v0 }
  0x2e   :  { %286 = vmatpush3.bf16.msra.mxu0 %v316_v10 }
  0x2f   :  { %287 = vmatprep.subr.bf16.mxu0 %v370_v0 }
  0x32   :  { %288 = vmatpush3.bf16.msra.mxu0 %v317_v11 }
  0x35   :  { %290 = vmatmul.mubr.bf16.vlgmr.msra.gmra.mrb[0].mxu0 %v318_v12 }
  0xec   :  { %v91_v13 = vpop.f32.mrb[0].mxu1 }
  0xed   :  { %v271_v14 = vpop.f32.mrb[1].mxu1  ;;  %v104_v18 = vadd.f32 %v246_v17, %v91_v13 }
  0xee   :  { %v94_v15 = vpop.f32.mrb[2].mxu1 }
  0xef   :  { %v272_v16 = vpop.f32.mrb[3].mxu1  ;;  %v105_v20 = vadd.f32 %v246_v17, %v94_v15 }
 0x108   :  { %v216_v19 = vpop.f32.mrb[0].mxu0 }
 0x109   :  { %v296_v21 = vadd.f32 %v216_v19, %v104_v18  ;;  %v291_v22 = vpop.f32.mrb[1].mxu0 }
 0x10a   :  { %v219_v23 = vpop.f32.mrb[2].mxu0 }
 0x10b   :  { %225 = vst [vmem:[#allocation5] sm:$0xff] %v296_v21  ;;  %v300_v24 = vadd.f32 %v219_v23, %v105_v20  ;;  %v292_v25 = vpop.f32.mrb[3].mxu0 }
 0x10d   :  { %226 = vst [vmem:[#allocation5 + $0x8] sm:$0xff] %v300_v24 }
 0x10e   :  { %352 = shalt.err (!%p349_p12)
}
 0x10f   :  { %s353_s15 = scalar_lea.hbm %s446_s5, 256 }
 0x110   :  { %p354_p13 = scmp.ne.s32.totalorder %s446_s5, %s353_s15  ;;  %p357_p0 = scmp.lt.u32.totalorder %s353_s15, %s446_s5 }
 0x112   :  { %p359_p1 = pnand %p357_p0, %p354_p13 }
 0x114   :  { %362 = shalt.err (!%p359_p1)
}
 0x115   :  { %s373_s20 = smov 128   ;;  %s374_s21 = smov 8  }
 0x116   :  { %238 = dma.vmem_to_hbm [thread:$0]  %s233_s13, 256, %s446_s5, [#allocation4], %s373_s20, %s373_s20, %s374_s21  }
 0x117   :  { %365 = dma.done.wait [#allocation4], 256  }
 0x118   :  { %366 = vsyncadd [#allocation4], 4294967040 }
 0x119   :  { %242 = vsyncpa [#allocation3], 1 }
 0x11a   :  { %243 = vsyncpa [#allocation4], 1 }

</bundles_post_ra>
